<compile_context>
chip_gen: v7x
topology: tpu7x:2x2x1
jax: 0.10.0
libtpu: 0.0.40
codegen_flags: <defaults>
</compile_context>

<pallas_src>
import functools

import jax
import jax.numpy as jnp
from jax import lax
from jax.experimental import pallas as pl
from jax.experimental.pallas import tpu as pltpu


def _speckle_kernel(x_ref, bw_ref, bh_ref, out_ref, *, kernel_size, out_h, out_w):
    # x_ref: (1, H, W) input tile; bw_ref: (W, OWp) column band; bh_ref: (OHp, H) row band.
    x = x_ref[0].astype(jnp.float32)          # (H, W)
    x2 = x * x

    bw = bw_ref[...]                          # (W, OWp)  ones-band, stride baked in
    bh = bh_ref[...]                          # (OHp, H)  ones-band, stride baked in

    # Box sums via MXU: horizontal pass then vertical pass.
    rs = jnp.dot(x, bw, preferred_element_type=jnp.float32)    # (H, OWp)
    rs2 = jnp.dot(x2, bw, preferred_element_type=jnp.float32)  # (H, OWp)
    s = jnp.dot(bh, rs, preferred_element_type=jnp.float32)    # (OHp, OWp)
    s2 = jnp.dot(bh, rs2, preferred_element_type=jnp.float32)  # (OHp, OWp)

    oh_p, ow_p = s.shape
    row = lax.broadcasted_iota(jnp.int32, (oh_p, ow_p), 0)
    col = lax.broadcasted_iota(jnp.int32, (oh_p, ow_p), 1)
    valid = (row < out_h) & (col < out_w)

    # C^2 = (k^2 * s2) / s^2 - 1   (exactly var/mean^2 of the window)
    k2 = float(kernel_size * kernel_size)
    denom = jnp.where(valid, s * s, 1.0)      # padded windows -> safe denominator
    c2 = k2 * s2 / denom - 1.0
    partial = jnp.sum(jnp.where(valid, c2, 0.0))

    # Lane-dense per-program partial (reduced outside the kernel).
    out_ref[...] = jnp.full(out_ref.shape, partial, out_ref.dtype)


def speckle_contrast_loss(intensity, kernel_size=11, step_size=(1, 1)):
    """Pallas-backed equivalent of speckle_contrast.forward(intensity)."""
    if intensity.ndim == 2:
        intensity = intensity.reshape((1, 1) + intensity.shape)
    N, C, H, W = intensity.shape
    assert C == 1, "conv weight has in_channels == 1 (matches the PyTorch module)"

    k = kernel_size
    sh, sw = step_size
    out_h = (H - k) // sh + 1
    out_w = (W - k) // sw + 1
    total = float(N * out_h * out_w)

    # Lane/sublane-aligned padded output tile sizes.
    ow_pad = pl.cdiv(out_w, 128) * 128
    oh_pad = pl.cdiv(out_h, 8) * 8

    # Keep original dtype through the DMA; cast to f32 inside the kernel.
    x = intensity.reshape(N, H, W)

    # Band-of-ones matrices implementing the (strided) separable box filter.
    #   bw[j, c] = 1  iff  c*sw <= j < c*sw + k   and c < out_w
    #   bh[r, i] = 1  iff  r*sh <= i < r*sh + k   and r < out_h
    j = jnp.arange(W)[:, None]
    c = jnp.arange(ow_pad)[None, :]
    bw = (((c * sw) <= j) & (j < (c * sw + k)) & (c < out_w)).astype(jnp.float32)
    r = jnp.arange(oh_pad)[:, None]
    i = jnp.arange(H)[None, :]
    bh = (((r * sh) <= i) & (i < (r * sh + k)) & (r < out_h)).astype(jnp.float32)

    # Scoped-VMEM budget sized from the actual per-step footprint (with margin).
    in_bytes = jnp.dtype(x.dtype).itemsize
    est = (2 * H * W * in_bytes                 # double-buffered input block
           + 2 * (W * ow_pad + oh_pad * H) * 4  # band matrices
           + 2 * 8 * 128 * 4                    # output block
           + 2 * H * W * 4                      # x (f32), x^2
           + 2 * H * ow_pad * 4                 # rs, rs2
           + 6 * oh_pad * ow_pad * 4)           # s, s2, mask, c2, temps
    vmem_limit = int(min(max(int(est * 1.3), 32 * 2 ** 20), 64 * 2 ** 20))

    kern = functools.partial(_speckle_kernel, kernel_size=k,
                             out_h=out_h, out_w=out_w)

    partials = pl.pallas_call(
        kern,
        out_shape=jax.ShapeDtypeStruct((N, 8, 128), jnp.float32),
        grid_spec=pltpu.PrefetchScalarGridSpec(
            num_scalar_prefetch=0,
            grid=(N,),
            in_specs=[
                pl.BlockSpec((1, H, W), lambda b: (b, 0, 0)),
                pl.BlockSpec((W, ow_pad), lambda b: (0, 0)),   # resident constant
                pl.BlockSpec((oh_pad, H), lambda b: (0, 0)),   # resident constant
            ],
            out_specs=pl.BlockSpec((1, 8, 128), lambda b: (b, 0, 0)),
        ),
        compiler_params=pltpu.CompilerParams(
            dimension_semantics=("parallel",),
            vmem_limit_bytes=vmem_limit),
    )(x, bw, bh)

    return jnp.sum(partials[:, 0, 0]) / total


def _reference_loss(intensity, kernel_size=11, step_size=(1, 1)):
    """Pure-JAX reference mirroring the PyTorch module (for verification)."""
    if intensity.ndim == 2:
        intensity = intensity.reshape((1, 1) + intensity.shape)
    w = jnp.ones((1, 1, kernel_size, kernel_size), jnp.float32) / kernel_size ** 2
    conv = lambda t: lax.conv_general_dilated(
        t.astype(jnp.float32), w, window_strides=step_size, padding="VALID",
        dimension_numbers=("NCHW", "OIHW", "NCHW"))
    mean = conv(intensity)
    var = jnp.sqrt(conv(intensity.astype(jnp.float32) ** 2) - mean ** 2)
    c = var / mean
    return jnp.mean(c ** 2)


if __name__ == "__main__":
    key = jax.random.PRNGKey(0)

    # Test 1: default kernel_size=11, stride (1,1), small NCHW batch.
    k1, k2 = jax.random.split(key)
    x1 = jax.random.uniform(k1, (2, 1, 32, 32), jnp.float32,
                            minval=0.1, maxval=1.0)
    loss1 = jax.block_until_ready(speckle_contrast_loss(x1, 11, (1, 1)))
    ref1 = jax.block_until_ready(_reference_loss(x1, 11, (1, 1)))
    assert jnp.allclose(loss1, ref1, rtol=1e-4, atol=1e-5), (loss1, ref1)

    # Test 2: 2-D input, smaller kernel, stride (2, 2) (strides baked into bands).
    x2 = jax.random.uniform(k2, (24, 20), jnp.float32, minval=0.1, maxval=1.0)
    loss2 = jax.block_until_ready(speckle_contrast_loss(x2, 5, (2, 2)))
    ref2 = jax.block_until_ready(_reference_loss(x2, 5, (2, 2)))
    assert jnp.allclose(loss2, ref2, rtol=1e-4, atol=1e-5), (loss2, ref2)

    print("KERNEL_OK")
</pallas_src>

<mosaic_0001>
module attributes {stable_mosaic.version = 11 : i64} {
  func.func @_speckle_kernel(%arg0: i32, %arg1: memref<1x32x32xf32, #tpu.memory_space<vmem>>, %arg2: memref<32x128xf32, #tpu.memory_space<vmem>>, %arg3: memref<24x32xf32, #tpu.memory_space<vmem>>, %arg4: memref<1x8x128xf32, #tpu.memory_space<vmem>>) attributes {dimension_semantics = [#tpu.dimension_semantics<parallel>], iteration_bounds = array<i64: 2>, scalar_prefetch = 0 : i64, scratch_operands = 0 : i64, tpu.core_type = #tpu.core_type<tc>, window_params = [{transform_indices = @transform_0, window_bounds = array<i64: 1, 32, 32>}, {pipeline_mode = #tpu.pipeline_mode<synchronous>, transform_indices = @transform_1, window_bounds = array<i64: 32, 128>}, {pipeline_mode = #tpu.pipeline_mode<synchronous>, transform_indices = @transform_2, window_bounds = array<i64: 24, 32>}, {transform_indices = @transform_3, window_bounds = array<i64: 1, 8, 128>}]} {
    %c0 = arith.constant 0 : index
    %c0_0 = arith.constant 0 : index
    %c0_1 = arith.constant 0 : index
    %0 = vector.load %arg1[%c0, %c0_0, %c0_1] : memref<1x32x32xf32, #tpu.memory_space<vmem>>, vector<1x32x32xf32>
    %1 = vector.shape_cast %0 : vector<1x32x32xf32> to vector<32x32xf32>
    %2 = arith.mulf %1, %1 : vector<32x32xf32>
    %c0_2 = arith.constant 0 : index
    %c0_3 = arith.constant 0 : index
    %3 = vector.load %arg2[%c0_2, %c0_3] : memref<32x128xf32, #tpu.memory_space<vmem>>, vector<32x128xf32>
    %c0_4 = arith.constant 0 : index
    %c0_5 = arith.constant 0 : index
    %4 = vector.load %arg3[%c0_4, %c0_5] : memref<24x32xf32, #tpu.memory_space<vmem>>, vector<24x32xf32>
    %cst = arith.constant dense<0.000000e+00> : vector<32x128xf32>
    %5 = tpu.matmul %1, %3, %cst {dimension_numbers = #tpu.dot_dimension_numbers<[1], [0], [0], [1], [0, 0, 1, 1], [], []>} : vector<32x32xf32>, vector<32x128xf32>, vector<32x128xf32> -> vector<32x128xf32>
    %cst_6 = arith.constant dense<0.000000e+00> : vector<32x128xf32>
    %6 = tpu.matmul %2, %3, %cst_6 {dimension_numbers = #tpu.dot_dimension_numbers<[1], [0], [0], [1], [0, 0, 1, 1], [], []>} : vector<32x32xf32>, vector<32x128xf32>, vector<32x128xf32> -> vector<32x128xf32>
    %cst_7 = arith.constant dense<0.000000e+00> : vector<24x128xf32>
    %7 = tpu.matmul %4, %5, %cst_7 {dimension_numbers = #tpu.dot_dimension_numbers<[1], [0], [0], [1], [0, 0, 1, 1], [], []>} : vector<24x32xf32>, vector<32x128xf32>, vector<24x128xf32> -> vector<24x128xf32>
    %cst_8 = arith.constant dense<0.000000e+00> : vector<24x128xf32>
    %8 = tpu.matmul %4, %6, %cst_8 {dimension_numbers = #tpu.dot_dimension_numbers<[1], [0], [0], [1], [0, 0, 1, 1], [], []>} : vector<24x32xf32>, vector<32x128xf32>, vector<24x128xf32> -> vector<24x128xf32>
    %9 = tpu.iota {dimensions = array<i32: 0>} : vector<24x128xi32>
    %10 = tpu.iota {dimensions = array<i32: 1>} : vector<24x128xi32>
    %c22_i32 = arith.constant 22 : i32
    %11 = vector.broadcast %c22_i32 : i32 to vector<24x128xi32>
    %12 = arith.cmpi slt, %9, %11 : vector<24x128xi32>
    %c22_i32_9 = arith.constant 22 : i32
    %13 = vector.broadcast %c22_i32_9 : i32 to vector<24x128xi32>
    %14 = arith.cmpi slt, %10, %13 : vector<24x128xi32>
    %15 = arith.andi %12, %14 : vector<24x128xi1>
    %16 = arith.mulf %7, %7 : vector<24x128xf32>
    %cst_10 = arith.constant 1.000000e+00 : f32
    %17 = vector.broadcast %cst_10 : f32 to vector<24x128xf32>
    %18 = arith.select %15, %16, %17 : vector<24x128xi1>, vector<24x128xf32>
    %cst_11 = arith.constant 1.210000e+02 : f32
    %19 = vector.broadcast %cst_11 : f32 to vector<24x128xf32>
    %20 = arith.mulf %19, %8 : vector<24x128xf32>
    %21 = arith.divf %20, %18 : vector<24x128xf32>
    %cst_12 = arith.constant 1.000000e+00 : f32
    %22 = vector.broadcast %cst_12 : f32 to vector<24x128xf32>
    %23 = arith.subf %21, %22 : vector<24x128xf32>
    %cst_13 = arith.constant 0.000000e+00 : f32
    %24 = vector.broadcast %cst_13 : f32 to vector<24x128xf32>
    %25 = arith.select %15, %23, %24 : vector<24x128xi1>, vector<24x128xf32>
    %26 = vector.shape_cast %25 : vector<24x128xf32> to vector<1x24x128xf32>
    %cst_14 = arith.constant dense<0.000000e+00> : vector<1xf32>
    %27 = vector.multi_reduction <add>, %26, %cst_14 [1, 2] : vector<1x24x128xf32> to vector<1xf32>
    %28 = vector.shape_cast %27 : vector<1xf32> to vector<1x1x1xf32>
    %29 = vector.extract %28[0, 0, 0] : f32 from vector<1x1x1xf32>
    %30 = vector.broadcast %29 : f32 to vector<1x8x128xf32>
    %c0_15 = arith.constant 0 : index
    %c0_16 = arith.constant 0 : index
    %c0_17 = arith.constant 0 : index
    %31 = vector.load %arg4[%c0_15, %c0_16, %c0_17] : memref<1x8x128xf32, #tpu.memory_space<vmem>>, vector<1x8x128xf32>
    tpu.vector_store %arg4[%c0_15, %c0_16, %c0_17], %30 {strides = array<i32>} : memref<1x8x128xf32, #tpu.memory_space<vmem>>, vector<1x8x128xf32>,
    return
  }
  func.func @transform_0(%arg0: i32) -> (i32, i32, i32) {
    %c0_i32 = arith.constant 0 : i32
    %c0_i32_0 = arith.constant 0 : i32
    %c0_i32_1 = arith.constant 0 : i32
    return %arg0, %c0_i32, %c0_i32_0 : i32, i32, i32
  }
  func.func @transform_1(%arg0: i32) -> (i32, i32) {
    %c0_i32 = arith.constant 0 : i32
    %c0_i32_0 = arith.constant 0 : i32
    %c0_i32_1 = arith.constant 0 : i32
    return %c0_i32, %c0_i32_0 : i32, i32
  }
  func.func @transform_2(%arg0: i32) -> (i32, i32) {
    %c0_i32 = arith.constant 0 : i32
    %c0_i32_0 = arith.constant 0 : i32
    %c0_i32_1 = arith.constant 0 : i32
    return %c0_i32, %c0_i32_0 : i32, i32
  }
  func.func @transform_3(%arg0: i32) -> (i32, i32, i32) {
    %c0_i32 = arith.constant 0 : i32
    %c0_i32_0 = arith.constant 0 : i32
    %c0_i32_1 = arith.constant 0 : i32
    return %arg0, %c0_i32, %c0_i32_0 : i32, i32, i32
  }
}

</mosaic_0001>

<bundles_post_ra>
// kernel: tpu_custom_call.1
= control target key start
LH: loop header
LB: loop body
LE: loop exit
PB: predicated region body
PF: predicated region fallthrough
CT: control target
= control target key end

     0   :  { %8 = vsyncpa [#allocation3], 0  ;;  %s1444_s0 = inlined_call_operand.hbm [shape: f32[2,32,32], index: 0, kind: input, shape index: {}]   ;;  %s1445_s1 = inlined_call_operand.hbm [shape: f32[32,128], index: 1, kind: input, shape index: {}]   ;;  %s1446_s2 = inlined_call_operand.hbm [shape: f32[24,32], index: 2, kind: input, shape index: {}]   ;;  %s1447_s3 = inlined_call_operand.hbm [shape: f32[2,8,128], index: 3, kind: output, shape index: {}]  }
   0x1   :  { %10 = vsyncpa [#allocation3 + $0x1], 0 }
   0x2   :  { %11 = vsyncpa [#allocation6], 0 }
   0x3   :  { %12 = vsyncpa [#allocation4], 0 }
   0x4   :  { %14 = vsyncpa [#allocation4 + $0x1], 0  ;;  %s1169_s12 = smov 0   ;;  %s1171_s13 = smov 0  }
   0x5   :  { %s1173_s14 = smov 0   ;;  %s1175_s15 = smov 0  }
   0x6 LB: > { %s1190_s16 = sadd.s32 4294967295, %s1138_s15   ;;  %s747_s17 = sadd.s32 4294967294, %s1138_s15   ;;  %s1138_s15 = sphi %s1175_s15, %s1469_s15   ;;  %s1134_s14 = sphi %s1173_s14, %s1468_s14   ;;  %s1130_s13 = sphi %s1171_s13, %s1467_s13   ;;  %s1126_s12 = sphi %s1169_s12, %s1466_s12  }
   0x7   : > { %p40_p0 = scmp.ne.s32.totalorder %s1130_s13, %s1126_s12  ;;  %p1448_p1 = scmp.eq.s32.totalorder %s1190_s16, 0 }
   0x8   : > { %p112_p3 = scmp.eq.s32.totalorder %s747_s17, 1  ;;  %p748_p5 = scmp.ge.s32.totalorder %s1138_s15, 1 }
   0x9   : > { %p1199_p4 = por %p1448_p1, %p40_p0  ;;  %p119_p7 = scmp.lt.s32.totalorder %s1138_s15, 3 }
   0xa   : > { %p1204_p6 = por %p112_p3, %p40_p0  ;;  %s1140_s21 = smov [#allocation5]  }
   0xb   : > { %s1451_s18 = scalar_select %p1199_p4, 1, 0 }
   0xc   : > { %s1452_s19 = scalar_select %p1204_p6, 1, 0 }
   0xd   : > { %p1209_p8 = pnand %p748_p5, %p119_p7  ;;  %s131_s22 = sshll.u32 %s1140_s21, 4  ;;  %s1213_s22 = int_to_ptr.vmem [resolvable:$true] %s131_s22 }
   0xe   : > { %s1141_s24 = smov [#allocation7]   ;;  %s982_s28 = scalar_lea.hbm %s1445_s1, 512 }
   0xf   : > { %p916_p9 = pneg %p1209_p8  ;;  %s144_s25 = sshll.u32 %s1141_s24, 4  ;;  %s1224_s25 = int_to_ptr.vmem [resolvable:$true] %s144_s25 }
  0x10   : > { %p983_p12 = scmp.ne.s32.totalorder %s1445_s1, %s982_s28  ;;  %p989_p5 = scmp.lt.u32.totalorder %s982_s28, %s1445_s1 }
  0x11   : > { %p1220_p11 = pnand %p916_p9, %p1448_p1 }
  0x13   : > { %p984_p13 = pneg %p1220_p11 }
  0x15   : > { %p985_p0 = pnand %p984_p13, %p983_p12 }
  0x17   : > { %p986_p3 = pneg %p985_p0 }
  0x19   : > { %p991_p7 = pnand %p989_p5, %p986_p3 }
  0x1b   : > { %994 = shalt.err (!%p991_p7)
}
  0x1c   : > { %s995_s6 = scalar_lea.vmem %s1213_s22, 512  ;;  %p1003_p2 = scmp.lt.s32.totalorder %s1213_s22, %s1213_s22 }
  0x1d   : > { %p996_p9 = scmp.ne.s32.totalorder %s1213_s22, %s995_s6  ;;  %p1004_p12 = scmp.lt.s32.totalorder %s995_s6, %s995_s6 }
  0x1f   : > { %p998_p10 = pnand %p996_p9, %p984_p13  ;;  %p1005_p0 = por %p1004_p12, %p1003_p2 }
  0x21   : > { %p999_p1 = pneg %p998_p10 }
  0x23   : > { %p1006_p6 = pnand %p1005_p0, %p999_p1 }
  0x25   : > { %1009 = shalt.err (!%p1006_p6)
}
  0x26   : > { %s1142_s7 = smov 128   ;;  %s1143_s8 = smov 8  }
  0x27   : > { %919 = dma.hbm_to_vmem [thread:$0]  (!%p1220_p11), %s1445_s1, 512, %s1213_s22, [#allocation6], %s1142_s7, %s1142_s7, %s1143_s8  }
  0x28   : > { %s1010_s21 = scalar_lea.hbm %s1446_s2, 384 }
  0x29   : > { %p1011_p1 = scmp.ne.s32.totalorder %s1446_s2, %s1010_s21  ;;  %p1017_p10 = scmp.lt.u32.totalorder %s1010_s21, %s1446_s2 }
  0x2b   : > { %p1013_p2 = pnand %p1011_p1, %p984_p13 }
  0x2d   : > { %p1014_p6 = pneg %p1013_p2 }
  0x2f   : > { %p1019_p3 = pnand %p1017_p10, %p1014_p6 }
  0x31   : > { %1022 = shalt.err (!%p1019_p3)
}
  0x32   : > { %s1023_s22 = scalar_lea.vmem %s1224_s25, 384  ;;  %p1031_p12 = scmp.lt.s32.totalorder %s1224_s25, %s1224_s25 }
  0x33   : > { %p1024_p5 = scmp.ne.s32.totalorder %s1224_s25, %s1023_s22  ;;  %p1032_p0 = scmp.lt.s32.totalorder %s1023_s22, %s1023_s22 }
  0x35   : > { %p1026_p7 = pnand %p1024_p5, %p984_p13  ;;  %p1033_p1 = por %p1032_p0, %p1031_p12 }
  0x37   : > { %p1027_p9 = pneg %p1026_p7 }
  0x39   : > { %p1034_p2 = pnand %p1033_p1, %p1027_p9 }
  0x3b   : > { %1037 = shalt.err (!%p1034_p2)
}
  0x3c   : > { %922 = dma.hbm_to_vmem [thread:$0]  (!%p1220_p11), %s1446_s2, 384, %s1224_s25, [#allocation6], %s1142_s7, %s1142_s7, %s1143_s8  }
  0x3d   : > { %s1285_s23 = sadd.s32 1, %s1138_s15   ;;  %s27_s4 = sadd.s32 1, %s1134_s14 }
  0x3e   : > { %s24_s5 = ssub.s32 %s1138_s15, %s1285_s23  ;;  %p34_p13 = scmp.ne.s32.totalorder %s1134_s14, %s1130_s13 }
  0x3f   : > { %p25_p6 = scmp.eq.s32.totalorder %s24_s5, 0  ;;  %p35_p10 = scmp.eq.s32.totalorder %s1138_s15, 0 }
  0x40   : > { %p1455_p3 = scmp.eq.s32.totalorder %s1190_s16, 1  ;;  %p933_p7 = scmp.lt.s32.totalorder %s1138_s15, 2 }
  0x41   : > { %s1301_s9 = scalar_select %p25_p6, %s1134_s14, %s27_s4  }
  0x42   : > { %p1295_p5 = por %p1455_p3, %p34_p13  ;;  %p36_p9 = por %p35_p10, %p34_p13 }
  0x43   : > { %s158_s10 = sand.u32 1, %s1134_s14   ;;  %s781_s25 = sshll.u32 %s1138_s15, 9 }
  0x44   : > { %s1456_s6 = scalar_select %p1295_p5, 1, 0 }
  0x45   : > { %s752_s11 = sshll.u32 %s158_s10, 5  ;;  %s1308_s24 = scalar_lea.hbm %s1444_s0, %s781_s25 }
  0x46   : > { %s162_s26 = scalar_lea.vmem [#allocation2], %s752_s11  ;;  %p1312_p11 = pnand %p933_p7, %p36_p9 }
  0x47   : > { %s169_s27 = sshll.u32 %s162_s26, 4  ;;  %s1316_s22 = scalar_lea.sflag [#allocation3], %s158_s10  ;;  %s1310_s27 = int_to_ptr.vmem [resolvable:$true] %s169_s27 }
  0x48   : > { %s1038_s29 = scalar_lea.hbm %s1308_s24, 512  ;;  %p1040_p0 = pneg %p1312_p11 }
  0x49   : > { %p1039_p12 = scmp.ne.s32.totalorder %s1308_s24, %s1038_s29  ;;  %s1043_s5 = scalar_lea.hbm %s1444_s0, 1024 }
  0x4a   : > { %p1044_p13 = scmp.lt.u32.totalorder %s1308_s24, %s1444_s0  ;;  %p1045_p6 = scmp.lt.u32.totalorder %s1043_s5, %s1038_s29 }
  0x4b   : > { %p1041_p1 = pnand %p1040_p0, %p1039_p12  ;;  %p1047_p3 = scmp.lt.u32.totalorder %s1038_s29, %s1308_s24 }
  0x4c   : > { %p1046_p10 = por %p1045_p6, %p1044_p13 }
  0x4d   : > { %p1042_p2 = pneg %p1041_p1 }
  0x4e   : > { %p1048_p7 = por %p1047_p3, %p1046_p10 }
  0x50   : > { %p1049_p9 = pnand %p1048_p7, %p1042_p2 }
  0x52   : > { %1052 = shalt.err (!%p1049_p9)
}
  0x53   : > { %s1053_s10 = scalar_lea.vmem %s1310_s27, 512  ;;  %s1144_s17 = smov [#allocation2]  }
  0x54   : > { %p1054_p12 = scmp.ne.s32.totalorder %s1310_s27, %s1053_s10  ;;  %s1058_s21 = sshll.u32 %s1144_s17, 4  ;;  %s1059_s21 = int_to_ptr.vmem [resolvable:$false] %s1058_s21 }
  0x55   : > { %s1060_s26 = scalar_lea.vmem %s1059_s21, 1024  ;;  %p1061_p4 = scmp.lt.s32.totalorder %s1310_s27, %s1059_s21 }
  0x56   : > { %p1056_p1 = pnand %p1054_p12, %p1040_p0  ;;  %p1062_p13 = scmp.lt.s32.totalorder %s1060_s26, %s1053_s10 }
  0x58   : > { %p1057_p5 = pneg %p1056_p1  ;;  %p1063_p6 = por %p1062_p13, %p1061_p4 }
  0x5a   : > { %p1064_p10 = pnand %p1063_p6, %p1057_p5 }
  0x5c   : > { %1067 = shalt.err (!%p1064_p10)
}
  0x5d   : > { %926 = dma.hbm_to_vmem [thread:$0]  (!%p1312_p11), %s1308_s24, 512, %s1310_s27, %s1316_s22, %s1142_s7, %s1142_s7, %s1143_s8  }
  0x5e   : > { %181 = sbr.rel (%p1209_p8) target bundleno = 798 (0x31e), region = 32  ;;  %s1350_s29 = sand.u32 (!%p1209_p8), 1, %s1130_s13  }
  0x5f   : > { %s756_s30 = sshll.u32 (!%p1209_p8), %s1350_s29, 5  ;;  %s184_s4 = scalar_lea.sflag (!%p1209_p8), [#allocation3], %s1350_s29 }
  0x60   : > { %s187_s5 = scalar_lea.vmem (!%p1209_p8), [#allocation2], %s756_s30  ;;  %p1458_p4 = scmp.ne.s32.totalorder (!%p1209_p8), %s1451_s18, 0 }
  0x65   : > { %1113 = dma.done.wait (%p1458_p4), %s184_s4, 512  }
  0x66   : > { %1115 = vsyncadd (%p1458_p4), %s184_s4, 4294966784  ;;  %p1459_p5 = scmp.eq.s32.totalorder %s1190_s16, 0 }
  0x68   : > { %1117 = dma.done.wait (%p1459_p5), [#allocation6], 896   ;;  %p1460_p11 = pmov %p1459_p5 }
  0x69   : > { %vm233_vm0 = vcmask 261120   ;;  %v226_v0 = vld [vmem:[#allocation5] sm:$0xff]  ;;  %v227_v1 = vld [vmem:[#allocation5 + $0x8] sm:$0xff]  ;;  %v228_v2 = vld [vmem:[#allocation5 + $0x10] sm:$0xff]  ;;  %v1145_v14 = vmov 0.0|0.0   ;;  %vm1146_vm1 = vmmov 0   ;;  %v597_v31 = vlaneseq }
  0x6a   : > { %1119 = vsyncadd (%p1460_p11), [#allocation6], 4294966400  ;;  %v874_v3 = vpack.c.bf16 %v227_v1, %v226_v0  ;;  %v229_v4 = vld [vmem:[#allocation5 + $0x18] sm:$0xff]  ;;  %v218_v5 = vld [vmem:[%s187_s5] sm:$0xff]  ;;  %v1147_v15 = vmov 0.0   ;;  %s759_s18 = sshll.u32 %s1350_s29, 3 }
  0x6b   : > { %v878_v6 = vpack.c.bf16 %v229_v4, %v228_v2  ;;  %820 = vmatprep.mubr.msk.f32.mxu0 %vm233_vm0, %v218_v5  ;;  %v222_v7 = vmul.f32 %v218_v5, %v218_v5  ;;  %v219_v8 = vld [vmem:[%s187_s5 + $0x8] sm:$0xff]  ;;  %v220_v10 = vld [vmem:[%s187_s5 + $0x10] sm:$0xff]  ;;  %v221_v12 = vld [vmem:[%s187_s5 + $0x18] sm:$0xff]  ;;  %v602_v32 = vand.u32 127, %v597_v31  ;;  %v598_v33 = vshrl.u32 %v597_v31, 7  ;;  %s217_s20 = scalar_lea.vmem [#allocation8], %s759_s18 }
  0x6c   : > { %875 = vmatprep.subr.bf16.mxu0 %v874_v3  ;;  %883 = vmatprep.subr.bf16.mxu1 %v874_v3  ;;  %v223_v9 = vmul.f32 %v219_v8, %v219_v8  ;;  %v224_v11 = vmul.f32 %v220_v10, %v220_v10  ;;  %v225_v13 = vmul.f32 %v221_v12, %v221_v12  ;;  %v230_v28 = vld [vmem:[#allocation7] sm:$0xff]  ;;  %v231_v29 = vld [vmem:[#allocation7 + $0x8] sm:$0xff]  ;;  %v232_v30 = vld [vmem:[#allocation7 + $0x10] sm:$0xff]  ;;  %s658_s7 = sshll.u32 %s217_s20, 4  ;;  %s778_s8 = sshll.u32 %s1190_s16, 7  ;;  %s1397_s7 = int_to_ptr.vmem [resolvable:$true] %s658_s7 }
  0x6d   : > { %877 = vmatpush3.bf16.msra.mxu0 %v874_v3  ;;  %885 = vmatpush3.bf16.msra.mxu1 %v874_v3  ;;  %vm606_vm2 = vcmp.lt.s32.totalorder %v602_v32, 22  ;;  %v600_v39 = vadd.s32 16, %v598_v33  ;;  %s1402_s22 = scalar_lea.hbm %s1447_s3, %s778_s8  ;;  %s645_s11 = scalar_lea.sflag [#allocation4], %s1350_s29 }
  0x6e   : > { %879 = vmatprep.subr.bf16.mxu0 %v878_v6  ;;  %887 = vmatprep.subr.bf16.mxu1 %v878_v6  ;;  %s1068_s25 = scalar_lea.vmem %s1397_s7, 128  ;;  %p1463_p0 = scmp.ne.s32.totalorder %s1456_s6, 0 }
  0x6f   : > { %834 = vmatprep.mubr.msk.f32.mxu1 %vm233_vm0, %v222_v7  ;;  %vm605_vm3 = vcmp.lt.s32.totalorder %v600_v39, 22  ;;  %p1069_p8 = scmp.ne.s32.totalorder %s1397_s7, %s1068_s25  ;;  %s1148_s16 = smov [#allocation8]  }
  0x70   : > { %vm1385_vm4 = vmand %vm605_vm3, %vm606_vm2  ;;  %s1072_s10 = sshll.u32 %s1148_s16, 4  ;;  %s1073_s10 = int_to_ptr.vmem [resolvable:$false] %s1072_s10 }
  0x71   : > { %881 = vmatpush3.bf16.msra.mxu0 %v878_v6  ;;  %889 = vmatpush3.bf16.msra.mxu1 %v878_v6  ;;  %p1070_p2 = pnand %p1069_p8, %p1463_p0  ;;  %s1074_s17 = scalar_lea.vmem %s1073_s10, 256 }
  0x72   : > { %890 = vmatprep.subr.bf16.mxu0 %v1145_v14  ;;  %896 = vmatprep.subr.bf16.mxu1 %v1145_v14  ;;  %p1075_p7 = scmp.lt.s32.totalorder %s1397_s7, %s1073_s10  ;;  %p1076_p9 = scmp.lt.s32.totalorder %s1074_s17, %s1068_s25 }
  0x73   : > { %p1071_p3 = pneg %p1070_p2 }
  0x74   : > { %821 = vmatmul.mubr.msk.f32.vlgmr.msra.gmra.mrb[0].mxu0 %vm233_vm0, %v219_v8  ;;  %835 = vmatmul.mubr.msk.f32.vlgmr.msra.gmra.mrb[0].mxu1 %vm233_vm0, %v223_v9  ;;  %p1077_p12 = por %p1076_p9, %p1075_p7 }
  0x75   : > { %823 = vmatprep.mubr.msk.f32.mxu0 %vm233_vm0, %v220_v10  ;;  %837 = vmatprep.mubr.msk.f32.mxu1 %vm233_vm0, %v224_v11 }
  0x76   : > { %p1078_p1 = pnand %p1077_p12, %p1071_p3 }
  0x78   : > { %824 = vmatmul.mubr.msk.f32.gmra.mrb[2].mxu0 %vm233_vm0, %v221_v12  ;;  %838 = vmatmul.mubr.msk.f32.gmra.mrb[2].mxu1 %vm233_vm0, %v225_v13 }
  0x79   : > { %848 = vmatprep.mubr.msk.f32.mxu0 %vm1146_vm1, %v1147_v15  ;;  %865 = vmatprep.mubr.msk.f32.mxu1 %vm1146_vm1, %v1147_v15 }
 0x147   : > { %v822_v16 = vpop.f32.mrb[0].mxu0  ;;  %v836_v17 = vpop.f32.mrb[0].mxu1 }
 0x148   : > { %v312_v18 = vpop.f32.mrb[1].mxu0  ;;  %v409_v19 = vpop.f32.mrb[1].mxu1 }
 0x149   : > { %v891_v20 = vpack.c.bf16 %v822_v16, %v312_v18  ;;  %v897_v21 = vpack.c.bf16 %v836_v17, %v409_v19 }
 0x14b   : > { %v825_v22 = vpop.f32.mrb[2].mxu0  ;;  %892 = vmatpush3.bf16.msra.mxu0 %v891_v20  ;;  %v839_v23 = vpop.f32.mrb[2].mxu1  ;;  %898 = vmatpush3.bf16.msra.mxu1 %v897_v21 }
 0x14c   : > { %v322_v24 = vpop.f32.mrb[3].mxu0  ;;  %893 = vmatprep.subr.bf16.mxu0 %v1145_v14  ;;  %v419_v25 = vpop.f32.mrb[3].mxu1  ;;  %899 = vmatprep.subr.bf16.mxu1 %v1145_v14 }
 0x14d   : > { %v894_v26 = vpack.c.bf16 %v825_v22, %v322_v24  ;;  %v900_v27 = vpack.c.bf16 %v839_v23, %v419_v25 }
 0x14f   : > { %895 = vmatpush3.bf16.msra.mxu0 %v894_v26  ;;  %901 = vmatpush3.bf16.msra.mxu1 %v900_v27 }
 0x152   : > { %849 = vmatmul.mubr.msk.f32.vlgmr.msra.gmra.mrb[4].mxu0 %vm233_vm0, %v230_v28  ;;  %866 = vmatmul.mubr.msk.f32.vlgmr.msra.gmra.mrb[4].mxu1 %vm233_vm0, %v230_v28 }
 0x153   : > { %851 = vmatprep.mubr.msk.f32.mxu0 %vm1146_vm1, %v1147_v15  ;;  %868 = vmatprep.mubr.msk.f32.mxu1 %vm1146_vm1, %v1147_v15 }
 0x156   : > { %852 = vmatmul.mubr.msk.f32.gmra.mrb[6].mxu0 %vm233_vm0, %v231_v29  ;;  %869 = vmatmul.mubr.msk.f32.gmra.mrb[6].mxu1 %vm233_vm0, %v231_v29 }
 0x157   : > { %854 = vmatprep.mubr.msk.f32.mxu0 %vm1146_vm1, %v1147_v15  ;;  %871 = vmatprep.mubr.msk.f32.mxu1 %vm1146_vm1, %v1147_v15 }
 0x15a   : > { %855 = vmatmul.mubr.msk.f32.gmra.mrb[8].mxu0 %vm233_vm0, %v232_v30  ;;  %872 = vmatmul.mubr.msk.f32.gmra.mrb[8].mxu1 %vm233_vm0, %v232_v30 }
 0x225   : > { %v503_v34 = vpop.f32.mrb[4].mxu0  ;;  %v583_v35 = vpop.f32.mrb[4].mxu1 }
 0x226   : > { %v610_v36 = vmul.f32 %v503_v34, %v503_v34  ;;  %v850_v37 = vpop.f32.mrb[5].mxu0  ;;  %v867_v38 = vpop.f32.mrb[5].mxu1  ;;  %v616_v53 = vmul.f32 121.0, %v583_v35 }
 0x228   : > { %v613_v40 = vsel %vm606_vm2, %v610_v36, 1.0 }
 0x229   : > { %976 = vrcp.f32 %v613_v40  ;;  %v508_v41 = vpop.f32.mrb[6].mxu0  ;;  %v588_v42 = vpop.f32.mrb[6].mxu1 }
 0x22a   : > { %v611_v43 = vmul.f32 %v508_v41, %v508_v41  ;;  %v853_v44 = vpop.f32.mrb[7].mxu0  ;;  %v870_v45 = vpop.f32.mrb[7].mxu1  ;;  %v617_v57 = vmul.f32 121.0, %v588_v42 }
 0x22c   : > { %v614_v46 = vsel %vm606_vm2, %v611_v43, 1.0 }
 0x22d   : > { %978 = vrcp.f32 %v614_v46  ;;  %v513_v47 = vpop.f32.mrb[8].mxu0  ;;  %v593_v48 = vpop.f32.mrb[8].mxu1 }
 0x22e   : > { %v612_v50 = vmul.f32 %v513_v47, %v513_v47  ;;  %v856_v51 = vpop.f32.mrb[9].mxu0  ;;  %v873_v52 = vpop.f32.mrb[9].mxu1  ;;  %v618_v61 = vmul.f32 121.0, %v593_v48 }
 0x230   : > { %v615_v54 = vsel %vm1385_vm4, %v612_v50, 1.0 }
 0x231   : > { %980 = vrcp.f32 %v615_v54 }
 0x233   : > { %v977_v55 = vpop.eup %976 }
 0x234   : > { %v620_v56 = vmul.f32 %v977_v55, %v616_v53 }
 0x236   : > { %v774_v59 = vadd.f32 -1.0, %v620_v56 }
 0x237   : > { %v979_v58 = vpop.eup %978 }
 0x238   : > { %v622_v60 = vmul.f32 %v979_v58, %v617_v57  ;;  %v628_v1 = vsel %vm606_vm2, %v774_v59, 0.0 }
 0x23a   : > { %v775_v62 = vadd.f32 -1.0, %v622_v60 }
 0x23b   : > { %v981_v63 = vpop.eup %980 }
 0x23c   : > { %v624_v0 = vmul.f32 %v981_v63, %v618_v61  ;;  %v629_v2 = vsel %vm606_vm2, %v775_v62, 0.0 }
 0x23d   : > { %v631_v3 = vadd.f32 %v629_v2, %v628_v1 }
 0x23e   : > { %v776_v4 = vadd.f32 -1.0, %v624_v0 }
 0x240   : > { %v630_v5 = vsel %vm1385_vm4, %v776_v4, 0.0 }
 0x241   : > { %v632_v6 = vadd.f32 %v631_v3, %v630_v5 }
 0x243   : > { %633 = vadd.xlane.f32.xlu0 %v632_v6 }
 0x2d0   : > { %v634_v7 = vpop.xlane.xlu0 %633 }
 0x2d1   : > { %v635_v8 = vrot.slane %v634_v7, 4 }
 0x2d3   : > { %v636_v9 = vadd.f32 %v635_v8, %v634_v7 }
 0x2d5   : > { %v637_v10 = vrot.slane %v636_v9, 2 }
 0x2d7   : > { %v638_v11 = vadd.f32 %v637_v10, %v636_v9 }
 0x2d9   : > { %v639_v12 = vrot.slane %v638_v11, 1 }
 0x2db   : > { %v640_v13 = vadd.f32 %v639_v12, %v638_v11 }
 0x2dd   : > { %902 = vpush %v640_v13 }
 0x30e   : > { %s903_s24 = spop %902 }
 0x30f   : > { %v642_v14 = vstv %s903_s24 }
 0x310   : > { %643 = vst [vmem:[%s217_s20] sm:$0xff] %v642_v14 }
 0x311   : > { %1081 = shalt.err (!%p1078_p1)
}
 0x312   : > { %s1082_s21 = scalar_lea.hbm %s1402_s22, 128  ;;  %s1086_s30 = scalar_lea.hbm %s1447_s3, 256 }
 0x313   : > { %p1083_p13 = scmp.ne.s32.totalorder %s1402_s22, %s1082_s21  ;;  %p1087_p4 = scmp.lt.u32.totalorder %s1402_s22, %s1447_s3 }
 0x314   : > { %p1088_p5 = scmp.lt.u32.totalorder %s1086_s30, %s1082_s21  ;;  %p1090_p8 = scmp.lt.u32.totalorder %s1082_s21, %s1402_s22 }
 0x315   : > { %p1084_p6 = pnand %p1083_p13, %p1463_p0 }
 0x316   : > { %p1089_p11 = por %p1088_p5, %p1087_p4 }
 0x317   : > { %p1085_p10 = pneg %p1084_p6 }
 0x318   : > { %p1091_p2 = por %p1090_p8, %p1089_p11 }
 0x31a   : > { %p1092_p3 = pnand %p1091_p2, %p1085_p10 }
 0x31c   : > { %1095 = shalt.err (!%p1092_p3)
}
 0x31d   : > { %914 = dma.vmem_to_hbm [thread:$0]  (%p1463_p0), %s1397_s7, 128, %s1402_s22, %s645_s11  }
 0x31e PF: > { %s670_s18 = sand.u32 1, %s1126_s12   ;;  %p1464_p7 = scmp.ne.s32.totalorder %s1452_s19, 0 }
 0x31f   : > { %p1465_p9 = scmp.ge.s32.totalorder %s1138_s15, 2  ;;  %s671_s20 = scalar_lea.sflag [#allocation4], %s670_s18 }
 0x321   : > { %p928_p12 = pnand %p1465_p9, %p1464_p7 }
 0x323   : > { %1121 = dma.done.wait (!%p928_p12), %s671_s20, 128  }
 0x324   : > { %1123 = vsyncadd (!%p928_p12), %s671_s20, 4294967168  ;;  %p17_p1 = scmp.ge.s32.totalorder %s1285_s23, 4   ;;  %s1466_s12 = smov %s1130_s13 }
 0x325   : > { %s1467_s13 = smov %s1134_s14  ;;  %s1468_s14 = smov %s1301_s9 }
 0x326   : > { %s1469_s15 = smov %s1285_s23  ;;  %19 = sbr.rel (!%p17_p1) target bundleno = 6 (0x6), region = 85 }
 0x32d   :  { %676 = vsyncpa [#allocation3], 1 }
 0x32e   :  { %678 = vsyncpa [#allocation3 + $0x1], 1 }
 0x32f   :  { %679 = vsyncpa [#allocation6], 1 }
 0x330   :  { %680 = vsyncpa [#allocation4], 1 }
 0x331   :  { %682 = vsyncpa [#allocation4 + $0x1], 1 }

</bundles_post_ra>
